<compile_context>
chip_gen: v6e
topology: v6e:2x2x1
jax: 0.10.0
libtpu: 0.0.40
codegen_flags: <defaults>
</compile_context>

<pallas_src>
import functools

import jax
import jax.numpy as jnp
from jax import lax
from jax.experimental import pallas as pl
from jax.experimental.pallas import tpu as pltpu


def _tpu_generation() -> int:
    """Best-effort TPU generation sniff (5 / 6 / 7); 0 if unknown."""
    try:
        kind = jax.devices()[0].device_kind.lower()
    except Exception:
        return 0
    for g in (7, 6, 5):
        if f"v{g}" in kind:
            return g
    return 0


def _xe_partial_kernel(tgt_ref, pred_ref, out_ref, *, upcast_select):
    """One (row-tile, vocab-tile) grid step.

    tgt_ref : (TN, 1)  int32     -- target vocab id, or -1 for masked/padded rows
    pred_ref: (TN, TV) f32/bf16  -- one vocab tile of the log-probs
    out_ref : (TN, 1)  f32       -- per-row picked log-prob; resident (same block)
                                    across the vocab grid axis -> accumulator
    """
    j = pl.program_id(1)
    tn, tv = pred_ref.shape

    @pl.when(j == 0)
    def _init():
        out_ref[...] = jnp.zeros_like(out_ref)

    # Per-row local target: a (TN,1) subtract instead of a full-tile
    # `j*tv + iota` add.  Masked rows carry -1 -> never match; targets that
    # live in other vocab tiles fall outside [0, tv) -> never match.  Garbage
    # in ragged edge blocks is never selected for the same reason.
    local_tgt = tgt_ref[...] - j * tv
    hit = lax.broadcasted_iota(jnp.int32, (tn, tv), 1) == local_tgt

    tile = pred_ref[...]
    if upcast_select:  # v5e / unknown chip (no native bf16 VPU) or f32 input
        tile = tile.astype(jnp.float32)
    # Select in the (possibly packed bf16) input dtype with a dtype-matched
    # zero; the vocab-axis row-sum is exact because each row has at most one
    # non-zero term.  Only the (TN,1) picked column is upcast to f32.
    contrib = jnp.where(hit, tile, jnp.zeros_like(tile))
    picked = jnp.sum(contrib, axis=1, keepdims=True).astype(jnp.float32)
    out_ref[...] += picked


def xe_criterion(pred, target, lengths, *, row_tile=512, vocab_tile=None):
    """pred: (B, T, V) log-probs (f32 or bf16); target: (B, T) int; lengths: (B,) int.

    Returns the scalar masked-mean NLL (f32).  Precondition (same as the
    PyTorch module): sum(lengths) > 0, max(lengths) == T, targets in [0, V).
    """
    B, T, V = pred.shape
    N = B * T
    target = target.astype(jnp.int32)
    lengths = lengths.astype(jnp.int32)

    gen = _tpu_generation()
    itemsize = jnp.dtype(pred.dtype).itemsize

    # Dtype-aware tile: ~8 MiB per pred buffer (16 MiB double-buffered).
    if vocab_tile is None:
        vocab_tile = 8192 if itemsize <= 2 else 4096
    # Scoped VMEM budget by generation (do NOT copy 64 MiB to v7x's 64 MiB VMEM).
    vmem_limit = (64 if gen in (5, 6) else 48) * 1024 * 1024
    # bf16 select/row-reduce only where the VPU handles bf16 natively.
    upcast_select = not (pred.dtype == jnp.bfloat16 and gen in (6, 7))

    # Fold the sequence mask into the target ids: positions t >= lengths[b]
    # get -1 and contribute exactly 0.  O(B*T) wrapper work, negligible.
    t_ids = jnp.arange(T, dtype=jnp.int32)[None, :]
    tgt_masked = jnp.where(t_ids < lengths[:, None], target, -1)
    tgt_flat = tgt_masked.reshape(N, 1)
    pred2d = pred.reshape(N, V)  # no dtype cast: bf16 stays bf16 in HBM

    # Row tile: keep >=2 row blocks whenever possible so both v7x TensorCores
    # get work along the "parallel" axis.
    if N <= row_tile:
        if N <= 8:
            tn = N                      # full dim (no (8,128) constraint)
        else:
            half = (N + 1) // 2
            tn = min(N, max(8, ((half + 7) // 8) * 8))
    else:
        tn = row_tile                   # multiple of 8
    tv = V if V <= vocab_tile else vocab_tile  # full dim, or a multiple of 128
    nr = pl.cdiv(N, tn)
    nv = pl.cdiv(V, tv)
    n_pad = nr * tn

    # Pad target rows (cheap, O(N) ints) so ragged last row blocks never read
    # garbage target ids.  pred itself stays unpadded: garbage in a ragged
    # edge block is never selected (-1 targets / out-of-vocab columns).
    if n_pad != N:
        tgt_flat = jnp.pad(tgt_flat, ((0, n_pad - N), (0, 0)), constant_values=-1)

    cost = pl.CostEstimate(
        flops=3 * N * V,                 # compare + select + row-reduce add
        transcendentals=0,
        bytes_accessed=N * V * itemsize + n_pad * 4 + n_pad * 4,
    )

    kernel = functools.partial(_xe_partial_kernel, upcast_select=upcast_select)
    partials = pl.pallas_call(
        kernel,
        out_shape=jax.ShapeDtypeStruct((n_pad, 1), jnp.float32),
        grid=(nr, nv),
        in_specs=[
            pl.BlockSpec((tn, 1), lambda i, j: (i, 0)),
            pl.BlockSpec((tn, tv), lambda i, j: (i, j)),
        ],
        out_specs=pl.BlockSpec((tn, 1), lambda i, j: (i, 0)),
        compiler_params=pltpu.CompilerParams(
            dimension_semantics=("parallel", "arbitrary"),
            vmem_limit_bytes=vmem_limit,
        ),
        cost_estimate=cost,
    )(tgt_flat, pred2d)

    # Finalize: negate once and divide by sum(lengths) (== sum(mask) since
    # max(lengths) == T in the reference module).  Guard against denom == 0.
    denom = jnp.sum(jnp.minimum(lengths, T)).astype(jnp.float32)
    denom = jnp.maximum(denom, 1.0)
    return -jnp.sum(partials) / denom


def xe_criterion_ref(pred, target, lengths):
    B, T, V = pred.shape
    picked = jnp.take_along_axis(pred.astype(jnp.float32),
                                 target[:, :, None].astype(jnp.int32),
                                 axis=2)[..., 0]
    mask = (jnp.arange(T)[None, :] < lengths[:, None]).astype(jnp.float32)
    return jnp.sum(-picked * mask) / jnp.sum(mask)


if __name__ == "__main__":
    B, T, V = 2, 8, 32
    key = jax.random.PRNGKey(0)
    k1, k2 = jax.random.split(key)
    # pred as log-probs (what the gather expects in the original training loop)
    logits = jax.random.normal(k1, (B, T, V), dtype=jnp.float32)
    pred = jax.nn.log_softmax(logits, axis=-1)
    target = jax.random.randint(k2, (B, T), 0, V, dtype=jnp.int32)
    lengths = jnp.array([T, 5], dtype=jnp.int32)  # max(lengths) == T

    loss = jax.block_until_ready(xe_criterion(pred, target, lengths))
    ref = jax.block_until_ready(xe_criterion_ref(pred, target, lengths))
    assert jnp.allclose(loss, ref, atol=1e-5, rtol=1e-5), (loss, ref)

    # bf16 path (exercises the packed select / row-reduce on v6e/v7x).
    pred_bf16 = pred.astype(jnp.bfloat16)
    loss_bf = jax.block_until_ready(xe_criterion(pred_bf16, target, lengths))
    ref_bf = jax.block_until_ready(xe_criterion_ref(pred_bf16, target, lengths))
    assert jnp.allclose(loss_bf, ref_bf, atol=1e-3, rtol=1e-3), (loss_bf, ref_bf)

    print("KERNEL_OK")
</pallas_src>

<mosaic_0001>
module attributes {stable_mosaic.version = 11 : i64} {
  func.func @_xe_partial_kernel(%arg0: i32, %arg1: i32, %arg2: memref<8x1xi32, #tpu.memory_space<vmem>>, %arg3: memref<8x32xf32, #tpu.memory_space<vmem>>, %arg4: memref<8x1xf32, #tpu.memory_space<vmem>>) attributes {dimension_semantics = [#tpu.dimension_semantics<parallel>, #tpu.dimension_semantics<arbitrary>], iteration_bounds = array<i64: 2, 1>, scalar_prefetch = 0 : i64, scratch_operands = 0 : i64, tpu.core_type = #tpu.core_type<tc>, window_params = [{transform_indices = @transform_0, window_bounds = array<i64: 8, 1>}, {transform_indices = @transform_1, window_bounds = array<i64: 8, 32>}, {transform_indices = @transform_2, window_bounds = array<i64: 8, 1>}]} {
    %c0_i32 = arith.constant 0 : i32
    %0 = arith.cmpi eq, %arg1, %c0_i32 : i32
    %1 = arith.extui %0 : i1 to i32
    %c0_i32_0 = arith.constant 0 : i32
    %2 = arith.cmpi ne, %1, %c0_i32_0 : i32
    scf.if %2 {
      %cst_9 = arith.constant 0.000000e+00 : f32
      %18 = vector.broadcast %cst_9 : f32 to vector<8x1xf32>
      %c0_10 = arith.constant 0 : index
      %c0_11 = arith.constant 0 : index
      %19 = vector.load %arg4[%c0_10, %c0_11] : memref<8x1xf32, #tpu.memory_space<vmem>>, vector<8x1xf32>
      tpu.vector_store %arg4[%c0_10, %c0_11], %18 {strides = array<i32>} : memref<8x1xf32, #tpu.memory_space<vmem>>, vector<8x1xf32>,
    } else {
    }
    %c0 = arith.constant 0 : index
    %c0_1 = arith.constant 0 : index
    %3 = vector.load %arg2[%c0, %c0_1] : memref<8x1xi32, #tpu.memory_space<vmem>>, vector<8x1xi32>
    %c32_i32 = arith.constant 32 : i32
    %4 = arith.muli %arg1, %c32_i32 : i32
    %5 = vector.broadcast %4 : i32 to vector<8x1xi32>
    %6 = arith.subi %3, %5 : vector<8x1xi32>
    %7 = tpu.iota {dimensions = array<i32: 1>} : vector<8x32xi32>
    %8 = vector.broadcast %6 : vector<8x1xi32> to vector<8x32xi32>
    %9 = arith.cmpi eq, %7, %8 : vector<8x32xi32>
    %c0_2 = arith.constant 0 : index
    %c0_3 = arith.constant 0 : index
    %10 = vector.load %arg3[%c0_2, %c0_3] : memref<8x32xf32, #tpu.memory_space<vmem>>, vector<8x32xf32>
    %cst = arith.constant 0.000000e+00 : f32
    %11 = vector.broadcast %cst : f32 to vector<8x32xf32>
    %12 = arith.select %9, %10, %11 : vector<8x32xi1>, vector<8x32xf32>
    %cst_4 = arith.constant dense<0.000000e+00> : vector<8xf32>
    %13 = vector.multi_reduction <add>, %12, %cst_4 [1] : vector<8x32xf32> to vector<8xf32>
    %14 = vector.shape_cast %13 : vector<8xf32> to vector<8x1xf32>
    %c0_5 = arith.constant 0 : index
    %c0_6 = arith.constant 0 : index
    %15 = vector.load %arg4[%c0_5, %c0_6] : memref<8x1xf32, #tpu.memory_space<vmem>>, vector<8x1xf32>
    %16 = arith.addf %15, %14 : vector<8x1xf32>
    %c0_7 = arith.constant 0 : index
    %c0_8 = arith.constant 0 : index
    %17 = vector.load %arg4[%c0_7, %c0_8] : memref<8x1xf32, #tpu.memory_space<vmem>>, vector<8x1xf32>
    tpu.vector_store %arg4[%c0_7, %c0_8], %16 {strides = array<i32>} : memref<8x1xf32, #tpu.memory_space<vmem>>, vector<8x1xf32>,
    return
  }
  func.func @transform_0(%arg0: i32, %arg1: i32) -> (i32, i32) {
    %c0_i32 = arith.constant 0 : i32
    %c0_i32_0 = arith.constant 0 : i32
    return %arg0, %c0_i32 : i32, i32
  }
  func.func @transform_1(%arg0: i32, %arg1: i32) -> (i32, i32) {
    %c0_i32 = arith.constant 0 : i32
    return %arg0, %arg1 : i32, i32
  }
  func.func @transform_2(%arg0: i32, %arg1: i32) -> (i32, i32) {
    %c0_i32 = arith.constant 0 : i32
    %c0_i32_0 = arith.constant 0 : i32
    return %arg0, %c0_i32 : i32, i32
  }
}

</mosaic_0001>

<bundles_post_ra>
// kernel: tpu_custom_call.1
= control target key start
LH: loop header
LB: loop body
LE: loop exit
PB: predicated region body
PF: predicated region fallthrough
CT: control target
= control target key end

     0   :  { %s359_s9 = smov 0   ;;  %s361_s10 = smov 0   ;;  %s397_s0 = inlined_call_operand.vmem [shape: s32[16,1], index: 0, kind: input, shape index: {}]   ;;  %s398_s1 = inlined_call_operand.vmem [shape: f32[16,32], index: 1, kind: input, shape index: {}]   ;;  %s399_s2 = inlined_call_operand.vmem [shape: f32[16,1], index: 2, kind: output, shape index: {}]  }
   0x1   :  { %s363_s11 = smov 0  }
   0x2 LB: > { %s24_s12 = sadd.s32 1, %s336_s10  ;;  %p285_p0 = scmp.ge.s32.totalorder %s340_s11, 1  ;;  %s340_s11 = sphi %s363_s11, %s12_s11   ;;  %s336_s10 = sphi %s361_s10, %s401_s10   ;;  %s332_s9 = sphi %s359_s9, %s400_s9  }
   0x3   : > { %p26_p1 = scmp.ge.s32.totalorder %s24_s12, 2  ;;  %p137_p2 = scmp.lt.s32.totalorder %s340_s11, 3 }
   0x5   : > { %s403_s12 = smov (%p26_p1, %s24_s12), 0  ;;  %p138_p3 = pnand %p285_p0, %p137_p2 }
   0x6   : > { %p164_p4 = scmp.lt.s32.totalorder (!%p138_p3), %s332_s9, 1 }
   0x7   : > { %141 = sbr.rel (%p138_p3) target bundleno = 284 (0x11c), region = 28 }
   0xc   : > { %v342_v0 = vmov 0   ;;  %s405_s9 = smov (!%p164_p4, %s332_s9), 1  ;;  %vm183_vm0 = vcmask 7168   ;;  %v343_v2 = vmov 0.0   ;;  %v189_v3 = vlaneseq }
   0xd   : > { %317 = vset.pattern.permute.xlu0 %v342_v0  ;;  %s286_s13 = sshll.u32 %s405_s9, 3  ;;  %vm197_vm1 = vcmask 261120  }
   0xe   : > { %s167_s16 = scalar_lea.vmem %s397_s0, %s286_s13  ;;  %s178_s19 = scalar_lea.vmem %s399_s2, %s286_s13  ;;  %v190_v4 = vand.u32 127, %v189_v3 }
   0xf   : > { %v185_v1 = vld [vmem:[%s167_s16] sm:$0xff]  ;;  %184 = vst.msk [vmem:[%s178_s19] sm:$0xff] %vm183_vm0, %v343_v2  ;;  %s174_s22 = scalar_lea.vmem %s398_s1, %s286_s13 }
  0x10   : > { %192 = vperm.xlu0 %317, %v185_v1   ;;  %v195_v5 = vld [vmem:[%s174_s22] sm:$0xff] }
  0x16   : > { %v201_v9 = vld [vmem:[%s178_s19] sm:$0xff] }
  0x8b   : > { %v193_v6 = vpop.permute.xlu0 %192 }
  0x8c   : > { %vm194_vm2 = vcmp.eq.s32.totalorder %v190_v4, %v193_v6 }
  0x8d   : > { %v196_v7 = vsel %vm194_vm2, %v195_v5, 0.0 }
  0x8e   : > { %v198_v8 = vsel %vm197_vm1, %v196_v7, 0.0 }
  0x8f   : > { %199 = vadd.xlane.f32.xlu0 %v198_v8 }
 0x118   : > { %v200_v10 = vpop.xlane.xlu0 %199 }
 0x119   : > { %v202_v11 = vadd.f32 %v201_v9, %v200_v10 }
 0x11b   : > { %204 = vst.msk [vmem:[%s178_s19] sm:$0xff] %vm183_vm0, %v202_v11 }
 0x11c PF: > { %s12_s11 = sadd.s32 1, %s340_s11   ;;  %s400_s9 = smov %s336_s10 }
 0x11d   : > { %p9_p5 = scmp.ge.s32.totalorder %s12_s11, 4   ;;  %s401_s10 = smov %s403_s12 }
 0x11f   :  { %11 = sbr.rel (!%p9_p5) target bundleno = 2 (0x2), region = 65 }

</bundles_post_ra>
